<compile_context>
chip_gen: v6e
topology: v6e:2x2x1
jax: 0.10.0
libtpu: 0.0.40
codegen_flags: <defaults>
</compile_context>

<pallas_src>
import jax
import jax.numpy as jnp
from jax.experimental import pallas as pl
from jax.experimental.pallas import tpu as pltpu


def _make_hbm_copy_kernel(chunks):
    """Build an HBM→HBM copy kernel.

    `chunks` is a static Python list of (row_start, row_size) tuples covering the
    leading axis of the (row-major, contiguous) 2-D view.  Every chunk is a
    contiguous HBM region; all chunk DMAs are started before the first wait so
    several DMA streams run concurrently.
    """

    def kernel(x_ref, o_ref, sem):
        descs = []
        for c, (start, size) in enumerate(chunks):
            cp = pltpu.make_async_copy(
                x_ref.at[pl.ds(start, size)],
                o_ref.at[pl.ds(start, size)],
                sem.at[c],
            )
            cp.start()
            descs.append(cp)
        # All DMAs must be waited on before the kernel returns.
        for cp in descs:
            cp.wait()

    return kernel


def _lane_dense_view(x):
    """Reshape x (free, row-major contiguous) into a 2-D lane-dense slab.

    Prefers a last dim that is a multiple of 128 AND leaves >= 8 rows so the
    leading axis can be split into several DMA chunks.  Falls back to
    (leading_dim, -1) / (1, n) only when n is not 128-divisible.
    """
    n = x.size
    lane = None
    # First pass: largest lane width that still leaves >= 8 rows to chunk.
    for cand in (8192, 4096, 2048, 1024, 512, 256, 128):
        if n % cand == 0 and n // cand >= 8:
            lane = cand
            break
    # Second pass: any 128-multiple lane width (tiny inputs).
    if lane is None:
        for cand in (1024, 512, 256, 128):
            if n % cand == 0:
                lane = cand
                break
    if lane is not None:
        return x.reshape(n // lane, lane)
    if x.ndim >= 2:
        return x.reshape(x.shape[0], -1)
    return x.reshape(1, -1)


def layer_interface_forward(x, *, strict=False, materialize=False):
    """Pallas 'forward' for LayerInterface.

    strict=True reproduces the PyTorch semantics exactly (raises
    NotImplementedError) without pulling the device array to host for the
    message.  strict=False returns x unchanged (the abstract forward defines no
    compute, so the optimal kernel is no kernel).  materialize=True runs a
    chunked HBM→HBM DMA Pallas kernel when a distinct output buffer is required.
    """
    if strict:
        # Report shape/dtype only: formatting the jax.Array itself would force a
        # device->host transfer just to raise.
        raise NotImplementedError(
            f"forward method not implemented in {LayerInterfacePallas}"
            f"\n\targs: (jax.Array(shape={tuple(x.shape)}, dtype={x.dtype}),)"
        )

    if not materialize:
        # No compute in the reference forward => zero-cost pass-through.
        return x

    orig_shape = x.shape
    dtype = x.dtype
    n = x.size
    itemsize = jnp.dtype(dtype).itemsize

    if n == 0:
        # TODO(synk): nothing to copy for a zero-size array; pass through.
        return x

    # ---- chunked HBM -> HBM DMA (no VMEM staging, no tiling constraints) ----
    x2 = _lane_dense_view(x)
    rows = x2.shape[0]

    # Split the leading axis into up to 8 contiguous chunks so several DMA
    # streams are in flight (also gives the runtime room to overlap them).
    num_chunks = max(1, min(8, rows))
    base, rem = divmod(rows, num_chunks)
    chunks = []
    start = 0
    for c in range(num_chunks):
        size = base + (1 if c < rem else 0)
        if size == 0:
            continue
        chunks.append((start, size))
        start += size
    num_chunks = len(chunks)

    kernel = _make_hbm_copy_kernel(chunks)

    y2 = pl.pallas_call(
        kernel,
        out_shape=jax.ShapeDtypeStruct(x2.shape, dtype),
        in_specs=[pl.BlockSpec(memory_space=pl.ANY)],   # raw HBM ref, no auto-DMA
        out_specs=pl.BlockSpec(memory_space=pl.ANY),    # raw HBM ref, kernel fills it
        scratch_shapes=[pltpu.SemaphoreType.DMA((num_chunks,))],
        # Memory-bound op: tell XLA so it schedules/overlaps it correctly.
        cost_estimate=pl.CostEstimate(
            flops=0, transcendentals=0, bytes_accessed=2 * n * itemsize
        ),
    )(x2)
    return y2.reshape(orig_shape)


class LayerInterfacePallas:
    """Thin Python analogue of the torch LayerInterface base class."""

    def __init__(self):
        # The torch __init__ defines no parameters; nothing to initialize.
        pass

    def __call__(self, x):
        # TODO(synk): subclasses of LayerInterface override forward(); the base
        # class itself only raises, so the default path is a zero-cost identity.
        return layer_interface_forward(x, strict=False, materialize=False)


if __name__ == "__main__":
    key = jax.random.PRNGKey(0)
    x = jax.random.normal(key, (2, 4, 16, 16), dtype=jnp.float32)

    layer = LayerInterfacePallas()

    # Default (optimal) path: no kernel, no HBM traffic.
    y_fast = layer(x)
    jax.block_until_ready(y_fast)
    assert y_fast.shape == x.shape and y_fast.dtype == x.dtype

    # Materialized path: run the chunked HBM->HBM DMA Pallas kernel on TPU.
    y_copy = layer_interface_forward(x, materialize=True)
    jax.block_until_ready(y_copy)
    assert y_copy.shape == x.shape and y_copy.dtype == x.dtype
    assert bool(jnp.all(y_copy == x))

    # Also exercise a non-128-divisible shape (fallback reshape path).
    x_odd = jax.random.normal(key, (3, 5, 7), dtype=jnp.float32)
    y_odd = layer_interface_forward(x_odd, materialize=True)
    jax.block_until_ready(y_odd)
    assert bool(jnp.all(y_odd == x_odd))

    # Strict path reproduces the reference-exact semantics (raises).
    raised = False
    try:
        layer_interface_forward(x, strict=True)
    except NotImplementedError:
        raised = True
    assert raised

    print("KERNEL_OK")
</pallas_src>

<mosaic_0001>
module attributes {stable_mosaic.version = 11 : i64} {
  func.func @kernel(%arg0: memref<8x256xf32, #tpu.memory_space<any>>, %arg1: memref<8x256xf32, #tpu.memory_space<any>>, %arg2: memref<8x!tpu.dma_semaphore, #tpu.memory_space<semaphore_mem>>) attributes {dimension_semantics = [], scalar_prefetch = 0 : i64, scratch_operands = 1 : i64, tpu.core_type = #tpu.core_type<tc>} {
    %c0_i32 = arith.constant 0 : i32
    %c0_i32_0 = arith.constant 0 : i32
    %c0_i32_1 = arith.constant 0 : i32
    %0 = tpu.memref_slice %arg0[%c0_i32_0, %c0_i32_1] : memref<8x256xf32, #tpu.memory_space<any>> -> memref<1x256xf32, #tpu.memory_space<any>>
    %c0_i32_2 = arith.constant 0 : i32
    %c0_i32_3 = arith.constant 0 : i32
    %1 = tpu.memref_slice %arg1[%c0_i32_2, %c0_i32_3] : memref<8x256xf32, #tpu.memory_space<any>> -> memref<1x256xf32, #tpu.memory_space<any>>
    %2 = tpu.memref_slice %arg2[%c0_i32] : memref<8x!tpu.dma_semaphore, #tpu.memory_space<semaphore_mem>> -> memref<1x!tpu.dma_semaphore, #tpu.memory_space<semaphore_mem>>
    %3 = tpu.memref_squeeze %2 : memref<1x!tpu.dma_semaphore, #tpu.memory_space<semaphore_mem>> -> memref<!tpu.dma_semaphore, #tpu.memory_space<semaphore_mem>>
    tpu.enqueue_dma source(%0 : memref<1x256xf32, #tpu.memory_space<any>>) target(%1 : memref<1x256xf32, #tpu.memory_space<any>>) target_semaphore(%3 : memref<!tpu.dma_semaphore, #tpu.memory_space<semaphore_mem>>)
    %c1_i32 = arith.constant 1 : i32
    %c1_i32_4 = arith.constant 1 : i32
    %c0_i32_5 = arith.constant 0 : i32
    %4 = tpu.memref_slice %arg0[%c1_i32_4, %c0_i32_5] : memref<8x256xf32, #tpu.memory_space<any>> -> memref<1x256xf32, #tpu.memory_space<any>>
    %c1_i32_6 = arith.constant 1 : i32
    %c0_i32_7 = arith.constant 0 : i32
    %5 = tpu.memref_slice %arg1[%c1_i32_6, %c0_i32_7] : memref<8x256xf32, #tpu.memory_space<any>> -> memref<1x256xf32, #tpu.memory_space<any>>
    %6 = tpu.memref_slice %arg2[%c1_i32] : memref<8x!tpu.dma_semaphore, #tpu.memory_space<semaphore_mem>> -> memref<1x!tpu.dma_semaphore, #tpu.memory_space<semaphore_mem>>
    %7 = tpu.memref_squeeze %6 : memref<1x!tpu.dma_semaphore, #tpu.memory_space<semaphore_mem>> -> memref<!tpu.dma_semaphore, #tpu.memory_space<semaphore_mem>>
    tpu.enqueue_dma source(%4 : memref<1x256xf32, #tpu.memory_space<any>>) target(%5 : memref<1x256xf32, #tpu.memory_space<any>>) target_semaphore(%7 : memref<!tpu.dma_semaphore, #tpu.memory_space<semaphore_mem>>)
    %c2_i32 = arith.constant 2 : i32
    %c2_i32_8 = arith.constant 2 : i32
    %c0_i32_9 = arith.constant 0 : i32
    %8 = tpu.memref_slice %arg0[%c2_i32_8, %c0_i32_9] : memref<8x256xf32, #tpu.memory_space<any>> -> memref<1x256xf32, #tpu.memory_space<any>>
    %c2_i32_10 = arith.constant 2 : i32
    %c0_i32_11 = arith.constant 0 : i32
    %9 = tpu.memref_slice %arg1[%c2_i32_10, %c0_i32_11] : memref<8x256xf32, #tpu.memory_space<any>> -> memref<1x256xf32, #tpu.memory_space<any>>
    %10 = tpu.memref_slice %arg2[%c2_i32] : memref<8x!tpu.dma_semaphore, #tpu.memory_space<semaphore_mem>> -> memref<1x!tpu.dma_semaphore, #tpu.memory_space<semaphore_mem>>
    %11 = tpu.memref_squeeze %10 : memref<1x!tpu.dma_semaphore, #tpu.memory_space<semaphore_mem>> -> memref<!tpu.dma_semaphore, #tpu.memory_space<semaphore_mem>>
    tpu.enqueue_dma source(%8 : memref<1x256xf32, #tpu.memory_space<any>>) target(%9 : memref<1x256xf32, #tpu.memory_space<any>>) target_semaphore(%11 : memref<!tpu.dma_semaphore, #tpu.memory_space<semaphore_mem>>)
    %c3_i32 = arith.constant 3 : i32
    %c3_i32_12 = arith.constant 3 : i32
    %c0_i32_13 = arith.constant 0 : i32
    %12 = tpu.memref_slice %arg0[%c3_i32_12, %c0_i32_13] : memref<8x256xf32, #tpu.memory_space<any>> -> memref<1x256xf32, #tpu.memory_space<any>>
    %c3_i32_14 = arith.constant 3 : i32
    %c0_i32_15 = arith.constant 0 : i32
    %13 = tpu.memref_slice %arg1[%c3_i32_14, %c0_i32_15] : memref<8x256xf32, #tpu.memory_space<any>> -> memref<1x256xf32, #tpu.memory_space<any>>
    %14 = tpu.memref_slice %arg2[%c3_i32] : memref<8x!tpu.dma_semaphore, #tpu.memory_space<semaphore_mem>> -> memref<1x!tpu.dma_semaphore, #tpu.memory_space<semaphore_mem>>
    %15 = tpu.memref_squeeze %14 : memref<1x!tpu.dma_semaphore, #tpu.memory_space<semaphore_mem>> -> memref<!tpu.dma_semaphore, #tpu.memory_space<semaphore_mem>>
    tpu.enqueue_dma source(%12 : memref<1x256xf32, #tpu.memory_space<any>>) target(%13 : memref<1x256xf32, #tpu.memory_space<any>>) target_semaphore(%15 : memref<!tpu.dma_semaphore, #tpu.memory_space<semaphore_mem>>)
    %c4_i32 = arith.constant 4 : i32
    %c4_i32_16 = arith.constant 4 : i32
    %c0_i32_17 = arith.constant 0 : i32
    %16 = tpu.memref_slice %arg0[%c4_i32_16, %c0_i32_17] : memref<8x256xf32, #tpu.memory_space<any>> -> memref<1x256xf32, #tpu.memory_space<any>>
    %c4_i32_18 = arith.constant 4 : i32
    %c0_i32_19 = arith.constant 0 : i32
    %17 = tpu.memref_slice %arg1[%c4_i32_18, %c0_i32_19] : memref<8x256xf32, #tpu.memory_space<any>> -> memref<1x256xf32, #tpu.memory_space<any>>
    %18 = tpu.memref_slice %arg2[%c4_i32] : memref<8x!tpu.dma_semaphore, #tpu.memory_space<semaphore_mem>> -> memref<1x!tpu.dma_semaphore, #tpu.memory_space<semaphore_mem>>
    %19 = tpu.memref_squeeze %18 : memref<1x!tpu.dma_semaphore, #tpu.memory_space<semaphore_mem>> -> memref<!tpu.dma_semaphore, #tpu.memory_space<semaphore_mem>>
    tpu.enqueue_dma source(%16 : memref<1x256xf32, #tpu.memory_space<any>>) target(%17 : memref<1x256xf32, #tpu.memory_space<any>>) target_semaphore(%19 : memref<!tpu.dma_semaphore, #tpu.memory_space<semaphore_mem>>)
    %c5_i32 = arith.constant 5 : i32
    %c5_i32_20 = arith.constant 5 : i32
    %c0_i32_21 = arith.constant 0 : i32
    %20 = tpu.memref_slice %arg0[%c5_i32_20, %c0_i32_21] : memref<8x256xf32, #tpu.memory_space<any>> -> memref<1x256xf32, #tpu.memory_space<any>>
    %c5_i32_22 = arith.constant 5 : i32
    %c0_i32_23 = arith.constant 0 : i32
    %21 = tpu.memref_slice %arg1[%c5_i32_22, %c0_i32_23] : memref<8x256xf32, #tpu.memory_space<any>> -> memref<1x256xf32, #tpu.memory_space<any>>
    %22 = tpu.memref_slice %arg2[%c5_i32] : memref<8x!tpu.dma_semaphore, #tpu.memory_space<semaphore_mem>> -> memref<1x!tpu.dma_semaphore, #tpu.memory_space<semaphore_mem>>
    %23 = tpu.memref_squeeze %22 : memref<1x!tpu.dma_semaphore, #tpu.memory_space<semaphore_mem>> -> memref<!tpu.dma_semaphore, #tpu.memory_space<semaphore_mem>>
    tpu.enqueue_dma source(%20 : memref<1x256xf32, #tpu.memory_space<any>>) target(%21 : memref<1x256xf32, #tpu.memory_space<any>>) target_semaphore(%23 : memref<!tpu.dma_semaphore, #tpu.memory_space<semaphore_mem>>)
    %c6_i32 = arith.constant 6 : i32
    %c6_i32_24 = arith.constant 6 : i32
    %c0_i32_25 = arith.constant 0 : i32
    %24 = tpu.memref_slice %arg0[%c6_i32_24, %c0_i32_25] : memref<8x256xf32, #tpu.memory_space<any>> -> memref<1x256xf32, #tpu.memory_space<any>>
    %c6_i32_26 = arith.constant 6 : i32
    %c0_i32_27 = arith.constant 0 : i32
    %25 = tpu.memref_slice %arg1[%c6_i32_26, %c0_i32_27] : memref<8x256xf32, #tpu.memory_space<any>> -> memref<1x256xf32, #tpu.memory_space<any>>
    %26 = tpu.memref_slice %arg2[%c6_i32] : memref<8x!tpu.dma_semaphore, #tpu.memory_space<semaphore_mem>> -> memref<1x!tpu.dma_semaphore, #tpu.memory_space<semaphore_mem>>
    %27 = tpu.memref_squeeze %26 : memref<1x!tpu.dma_semaphore, #tpu.memory_space<semaphore_mem>> -> memref<!tpu.dma_semaphore, #tpu.memory_space<semaphore_mem>>
    tpu.enqueue_dma source(%24 : memref<1x256xf32, #tpu.memory_space<any>>) target(%25 : memref<1x256xf32, #tpu.memory_space<any>>) target_semaphore(%27 : memref<!tpu.dma_semaphore, #tpu.memory_space<semaphore_mem>>)
    %c7_i32 = arith.constant 7 : i32
    %c7_i32_28 = arith.constant 7 : i32
    %c0_i32_29 = arith.constant 0 : i32
    %28 = tpu.memref_slice %arg0[%c7_i32_28, %c0_i32_29] : memref<8x256xf32, #tpu.memory_space<any>> -> memref<1x256xf32, #tpu.memory_space<any>>
    %c7_i32_30 = arith.constant 7 : i32
    %c0_i32_31 = arith.constant 0 : i32
    %29 = tpu.memref_slice %arg1[%c7_i32_30, %c0_i32_31] : memref<8x256xf32, #tpu.memory_space<any>> -> memref<1x256xf32, #tpu.memory_space<any>>
    %30 = tpu.memref_slice %arg2[%c7_i32] : memref<8x!tpu.dma_semaphore, #tpu.memory_space<semaphore_mem>> -> memref<1x!tpu.dma_semaphore, #tpu.memory_space<semaphore_mem>>
    %31 = tpu.memref_squeeze %30 : memref<1x!tpu.dma_semaphore, #tpu.memory_space<semaphore_mem>> -> memref<!tpu.dma_semaphore, #tpu.memory_space<semaphore_mem>>
    tpu.enqueue_dma source(%28 : memref<1x256xf32, #tpu.memory_space<any>>) target(%29 : memref<1x256xf32, #tpu.memory_space<any>>) target_semaphore(%31 : memref<!tpu.dma_semaphore, #tpu.memory_space<semaphore_mem>>)
    %c0_i32_32 = arith.constant 0 : i32
    %c0_i32_33 = arith.constant 0 : i32
    %c0_i32_34 = arith.constant 0 : i32
    %32 = tpu.memref_slice %arg0[%c0_i32_33, %c0_i32_34] : memref<8x256xf32, #tpu.memory_space<any>> -> memref<1x256xf32, #tpu.memory_space<any>>
    %c0_i32_35 = arith.constant 0 : i32
    %c0_i32_36 = arith.constant 0 : i32
    %33 = tpu.memref_slice %arg1[%c0_i32_35, %c0_i32_36] : memref<8x256xf32, #tpu.memory_space<any>> -> memref<1x256xf32, #tpu.memory_space<any>>
    %34 = tpu.memref_slice %arg2[%c0_i32_32] : memref<8x!tpu.dma_semaphore, #tpu.memory_space<semaphore_mem>> -> memref<1x!tpu.dma_semaphore, #tpu.memory_space<semaphore_mem>>
    %35 = tpu.memref_squeeze %34 : memref<1x!tpu.dma_semaphore, #tpu.memory_space<semaphore_mem>> -> memref<!tpu.dma_semaphore, #tpu.memory_space<semaphore_mem>>
    tpu.wait_dma2 semaphore(%35 : memref<!tpu.dma_semaphore, #tpu.memory_space<semaphore_mem>>) src(%32 : memref<1x256xf32, #tpu.memory_space<any>>) dst(%33 : memref<1x256xf32, #tpu.memory_space<any>>)
    %c1_i32_37 = arith.constant 1 : i32
    %c1_i32_38 = arith.constant 1 : i32
    %c0_i32_39 = arith.constant 0 : i32
    %36 = tpu.memref_slice %arg0[%c1_i32_38, %c0_i32_39] : memref<8x256xf32, #tpu.memory_space<any>> -> memref<1x256xf32, #tpu.memory_space<any>>
    %c1_i32_40 = arith.constant 1 : i32
    %c0_i32_41 = arith.constant 0 : i32
    %37 = tpu.memref_slice %arg1[%c1_i32_40, %c0_i32_41] : memref<8x256xf32, #tpu.memory_space<any>> -> memref<1x256xf32, #tpu.memory_space<any>>
    %38 = tpu.memref_slice %arg2[%c1_i32_37] : memref<8x!tpu.dma_semaphore, #tpu.memory_space<semaphore_mem>> -> memref<1x!tpu.dma_semaphore, #tpu.memory_space<semaphore_mem>>
    %39 = tpu.memref_squeeze %38 : memref<1x!tpu.dma_semaphore, #tpu.memory_space<semaphore_mem>> -> memref<!tpu.dma_semaphore, #tpu.memory_space<semaphore_mem>>
    tpu.wait_dma2 semaphore(%39 : memref<!tpu.dma_semaphore, #tpu.memory_space<semaphore_mem>>) src(%36 : memref<1x256xf32, #tpu.memory_space<any>>) dst(%37 : memref<1x256xf32, #tpu.memory_space<any>>)
    %c2_i32_42 = arith.constant 2 : i32
    %c2_i32_43 = arith.constant 2 : i32
    %c0_i32_44 = arith.constant 0 : i32
    %40 = tpu.memref_slice %arg0[%c2_i32_43, %c0_i32_44] : memref<8x256xf32, #tpu.memory_space<any>> -> memref<1x256xf32, #tpu.memory_space<any>>
    %c2_i32_45 = arith.constant 2 : i32
    %c0_i32_46 = arith.constant 0 : i32
    %41 = tpu.memref_slice %arg1[%c2_i32_45, %c0_i32_46] : memref<8x256xf32, #tpu.memory_space<any>> -> memref<1x256xf32, #tpu.memory_space<any>>
    %42 = tpu.memref_slice %arg2[%c2_i32_42] : memref<8x!tpu.dma_semaphore, #tpu.memory_space<semaphore_mem>> -> memref<1x!tpu.dma_semaphore, #tpu.memory_space<semaphore_mem>>
    %43 = tpu.memref_squeeze %42 : memref<1x!tpu.dma_semaphore, #tpu.memory_space<semaphore_mem>> -> memref<!tpu.dma_semaphore, #tpu.memory_space<semaphore_mem>>
    tpu.wait_dma2 semaphore(%43 : memref<!tpu.dma_semaphore, #tpu.memory_space<semaphore_mem>>) src(%40 : memref<1x256xf32, #tpu.memory_space<any>>) dst(%41 : memref<1x256xf32, #tpu.memory_space<any>>)
    %c3_i32_47 = arith.constant 3 : i32
    %c3_i32_48 = arith.constant 3 : i32
    %c0_i32_49 = arith.constant 0 : i32
    %44 = tpu.memref_slice %arg0[%c3_i32_48, %c0_i32_49] : memref<8x256xf32, #tpu.memory_space<any>> -> memref<1x256xf32, #tpu.memory_space<any>>
    %c3_i32_50 = arith.constant 3 : i32
    %c0_i32_51 = arith.constant 0 : i32
    %45 = tpu.memref_slice %arg1[%c3_i32_50, %c0_i32_51] : memref<8x256xf32, #tpu.memory_space<any>> -> memref<1x256xf32, #tpu.memory_space<any>>
    %46 = tpu.memref_slice %arg2[%c3_i32_47] : memref<8x!tpu.dma_semaphore, #tpu.memory_space<semaphore_mem>> -> memref<1x!tpu.dma_semaphore, #tpu.memory_space<semaphore_mem>>
    %47 = tpu.memref_squeeze %46 : memref<1x!tpu.dma_semaphore, #tpu.memory_space<semaphore_mem>> -> memref<!tpu.dma_semaphore, #tpu.memory_space<semaphore_mem>>
    tpu.wait_dma2 semaphore(%47 : memref<!tpu.dma_semaphore, #tpu.memory_space<semaphore_mem>>) src(%44 : memref<1x256xf32, #tpu.memory_space<any>>) dst(%45 : memref<1x256xf32, #tpu.memory_space<any>>)
    %c4_i32_52 = arith.constant 4 : i32
    %c4_i32_53 = arith.constant 4 : i32
    %c0_i32_54 = arith.constant 0 : i32
    %48 = tpu.memref_slice %arg0[%c4_i32_53, %c0_i32_54] : memref<8x256xf32, #tpu.memory_space<any>> -> memref<1x256xf32, #tpu.memory_space<any>>
    %c4_i32_55 = arith.constant 4 : i32
    %c0_i32_56 = arith.constant 0 : i32
    %49 = tpu.memref_slice %arg1[%c4_i32_55, %c0_i32_56] : memref<8x256xf32, #tpu.memory_space<any>> -> memref<1x256xf32, #tpu.memory_space<any>>
    %50 = tpu.memref_slice %arg2[%c4_i32_52] : memref<8x!tpu.dma_semaphore, #tpu.memory_space<semaphore_mem>> -> memref<1x!tpu.dma_semaphore, #tpu.memory_space<semaphore_mem>>
    %51 = tpu.memref_squeeze %50 : memref<1x!tpu.dma_semaphore, #tpu.memory_space<semaphore_mem>> -> memref<!tpu.dma_semaphore, #tpu.memory_space<semaphore_mem>>
    tpu.wait_dma2 semaphore(%51 : memref<!tpu.dma_semaphore, #tpu.memory_space<semaphore_mem>>) src(%48 : memref<1x256xf32, #tpu.memory_space<any>>) dst(%49 : memref<1x256xf32, #tpu.memory_space<any>>)
    %c5_i32_57 = arith.constant 5 : i32
    %c5_i32_58 = arith.constant 5 : i32
    %c0_i32_59 = arith.constant 0 : i32
    %52 = tpu.memref_slice %arg0[%c5_i32_58, %c0_i32_59] : memref<8x256xf32, #tpu.memory_space<any>> -> memref<1x256xf32, #tpu.memory_space<any>>
    %c5_i32_60 = arith.constant 5 : i32
    %c0_i32_61 = arith.constant 0 : i32
    %53 = tpu.memref_slice %arg1[%c5_i32_60, %c0_i32_61] : memref<8x256xf32, #tpu.memory_space<any>> -> memref<1x256xf32, #tpu.memory_space<any>>
    %54 = tpu.memref_slice %arg2[%c5_i32_57] : memref<8x!tpu.dma_semaphore, #tpu.memory_space<semaphore_mem>> -> memref<1x!tpu.dma_semaphore, #tpu.memory_space<semaphore_mem>>
    %55 = tpu.memref_squeeze %54 : memref<1x!tpu.dma_semaphore, #tpu.memory_space<semaphore_mem>> -> memref<!tpu.dma_semaphore, #tpu.memory_space<semaphore_mem>>
    tpu.wait_dma2 semaphore(%55 : memref<!tpu.dma_semaphore, #tpu.memory_space<semaphore_mem>>) src(%52 : memref<1x256xf32, #tpu.memory_space<any>>) dst(%53 : memref<1x256xf32, #tpu.memory_space<any>>)
    %c6_i32_62 = arith.constant 6 : i32
    %c6_i32_63 = arith.constant 6 : i32
    %c0_i32_64 = arith.constant 0 : i32
    %56 = tpu.memref_slice %arg0[%c6_i32_63, %c0_i32_64] : memref<8x256xf32, #tpu.memory_space<any>> -> memref<1x256xf32, #tpu.memory_space<any>>
    %c6_i32_65 = arith.constant 6 : i32
    %c0_i32_66 = arith.constant 0 : i32
    %57 = tpu.memref_slice %arg1[%c6_i32_65, %c0_i32_66] : memref<8x256xf32, #tpu.memory_space<any>> -> memref<1x256xf32, #tpu.memory_space<any>>
    %58 = tpu.memref_slice %arg2[%c6_i32_62] : memref<8x!tpu.dma_semaphore, #tpu.memory_space<semaphore_mem>> -> memref<1x!tpu.dma_semaphore, #tpu.memory_space<semaphore_mem>>
    %59 = tpu.memref_squeeze %58 : memref<1x!tpu.dma_semaphore, #tpu.memory_space<semaphore_mem>> -> memref<!tpu.dma_semaphore, #tpu.memory_space<semaphore_mem>>
    tpu.wait_dma2 semaphore(%59 : memref<!tpu.dma_semaphore, #tpu.memory_space<semaphore_mem>>) src(%56 : memref<1x256xf32, #tpu.memory_space<any>>) dst(%57 : memref<1x256xf32, #tpu.memory_space<any>>)
    %c7_i32_67 = arith.constant 7 : i32
    %c7_i32_68 = arith.constant 7 : i32
    %c0_i32_69 = arith.constant 0 : i32
    %60 = tpu.memref_slice %arg0[%c7_i32_68, %c0_i32_69] : memref<8x256xf32, #tpu.memory_space<any>> -> memref<1x256xf32, #tpu.memory_space<any>>
    %c7_i32_70 = arith.constant 7 : i32
    %c0_i32_71 = arith.constant 0 : i32
    %61 = tpu.memref_slice %arg1[%c7_i32_70, %c0_i32_71] : memref<8x256xf32, #tpu.memory_space<any>> -> memref<1x256xf32, #tpu.memory_space<any>>
    %62 = tpu.memref_slice %arg2[%c7_i32_67] : memref<8x!tpu.dma_semaphore, #tpu.memory_space<semaphore_mem>> -> memref<1x!tpu.dma_semaphore, #tpu.memory_space<semaphore_mem>>
    %63 = tpu.memref_squeeze %62 : memref<1x!tpu.dma_semaphore, #tpu.memory_space<semaphore_mem>> -> memref<!tpu.dma_semaphore, #tpu.memory_space<semaphore_mem>>
    tpu.wait_dma2 semaphore(%63 : memref<!tpu.dma_semaphore, #tpu.memory_space<semaphore_mem>>) src(%60 : memref<1x256xf32, #tpu.memory_space<any>>) dst(%61 : memref<1x256xf32, #tpu.memory_space<any>>)
    return
  }
}

</mosaic_0001>

<bundles_post_ra>
// kernel: tpu_custom_call.1
= control target key start
LH: loop header
LB: loop body
LE: loop exit
PB: predicated region body
PF: predicated region fallthrough
CT: control target
= control target key end

     0   :  { %s239_s6 = smov 128   ;;  %s240_s7 = smov 1   ;;  %s349_s0 = inlined_call_operand.hbm [shape: f32[8,256], index: 0, kind: input, shape index: {}]   ;;  %s350_s1 = inlined_call_operand.hbm [shape: f32[8,256], index: 1, kind: output, shape index: {}]  }
   0x1   :  { %12 = sst [smem:[#allocation4]] %s239_s6  ;;  %s241_s8 = smov [#allocation2]  }
   0x2   :  { %14 = sst [smem:[#allocation4 + $0x1]] %s239_s6  ;;  %s242_s9 = smov 131072  }
   0x3   :  { %16 = sst [smem:[#allocation4 + $0x2]] %s240_s7  ;;  %s243_s10 = smov 0  }
   0x4   :  { %18 = dma.general %s349_s0, 32, %s350_s1, %s241_s8, %s242_s9, [#allocation4], %s243_s10, 0  }
   0x5   :  { %28 = sst [smem:[#allocation6]] %s239_s6  ;;  %s19_s17 = scalar_lea.hbm %s349_s0, 16 }
   0x6   :  { %30 = sst [smem:[#allocation6 + $0x1]] %s239_s6  ;;  %s20_s20 = scalar_lea.hbm %s350_s1, 16 }
   0x7   :  { %32 = sst [smem:[#allocation6 + $0x2]] %s240_s7  ;;  %s244_s21 = smov [#allocation2 + $0x1]  }
   0x8   :  { %34 = dma.general %s19_s17, 32, %s20_s20, %s244_s21, %s242_s9, [#allocation6], %s243_s10, 0  }
   0x9   :  { %44 = sst [smem:[#allocation8]] %s239_s6  ;;  %s35_s24 = scalar_lea.hbm %s349_s0, 32 }
   0xa   :  { %46 = sst [smem:[#allocation8 + $0x1]] %s239_s6  ;;  %s36_s27 = scalar_lea.hbm %s350_s1, 32 }
   0xb   :  { %48 = sst [smem:[#allocation8 + $0x2]] %s240_s7  ;;  %s245_s28 = smov [#allocation2 + $0x2]  }
   0xc   :  { %50 = dma.general %s35_s24, 32, %s36_s27, %s245_s28, %s242_s9, [#allocation8], %s243_s10, 0  }
   0xd   :  { %60 = sst [smem:[#allocation10]] %s239_s6  ;;  %s51_s2 = scalar_lea.hbm %s349_s0, 48 }
   0xe   :  { %62 = sst [smem:[#allocation10 + $0x1]] %s239_s6  ;;  %s52_s5 = scalar_lea.hbm %s350_s1, 48 }
   0xf   :  { %64 = sst [smem:[#allocation10 + $0x2]] %s240_s7  ;;  %s246_s8 = smov [#allocation2 + $0x3]  }
  0x10   :  { %66 = dma.general %s51_s2, 32, %s52_s5, %s246_s8, %s242_s9, [#allocation10], %s243_s10, 0  }
  0x11   :  { %76 = sst [smem:[#allocation12]] %s239_s6  ;;  %s67_s13 = scalar_lea.hbm %s349_s0, 64 }
  0x12   :  { %78 = sst [smem:[#allocation12 + $0x1]] %s239_s6  ;;  %s68_s16 = scalar_lea.hbm %s350_s1, 64 }
  0x13   :  { %80 = sst [smem:[#allocation12 + $0x2]] %s240_s7  ;;  %s247_s17 = smov [#allocation2 + $0x4]  }
  0x14   :  { %82 = dma.general %s67_s13, 32, %s68_s16, %s247_s17, %s242_s9, [#allocation12], %s243_s10, 0  }
  0x15   :  { %92 = sst [smem:[#allocation14]] %s239_s6  ;;  %s83_s20 = scalar_lea.hbm %s349_s0, 80 }
  0x16   :  { %94 = sst [smem:[#allocation14 + $0x1]] %s239_s6  ;;  %s84_s23 = scalar_lea.hbm %s350_s1, 80 }
  0x17   :  { %96 = sst [smem:[#allocation14 + $0x2]] %s240_s7  ;;  %s248_s24 = smov [#allocation2 + $0x5]  }
  0x18   :  { %98 = dma.general %s83_s20, 32, %s84_s23, %s248_s24, %s242_s9, [#allocation14], %s243_s10, 0  }
  0x19   :  { %108 = sst [smem:[#allocation16]] %s239_s6  ;;  %s99_s27 = scalar_lea.hbm %s349_s0, 96 }
  0x1a   :  { %110 = sst [smem:[#allocation16 + $0x1]] %s239_s6  ;;  %s100_s30 = scalar_lea.hbm %s350_s1, 96 }
  0x1b   :  { %112 = sst [smem:[#allocation16 + $0x2]] %s240_s7  ;;  %s249_s2 = smov [#allocation2 + $0x6]  }
  0x1c   :  { %114 = dma.general %s99_s27, 32, %s100_s30, %s249_s2, %s242_s9, [#allocation16], %s243_s10, 0  }
  0x1d   :  { %124 = sst [smem:[#allocation18]] %s239_s6  ;;  %s115_s5 = scalar_lea.hbm %s349_s0, 112 }
  0x1e   :  { %126 = sst [smem:[#allocation18 + $0x1]] %s239_s6  ;;  %s116_s12 = scalar_lea.hbm %s350_s1, 112 }
  0x1f   :  { %128 = sst [smem:[#allocation18 + $0x2]] %s240_s7  ;;  %s250_s13 = smov [#allocation2 + $0x7]  }
  0x20   :  { %130 = dma.general %s115_s5, 32, %s116_s12, %s250_s13, %s242_s9, [#allocation18], %s243_s10, 0  }
  0x21   :  { %223 = dma.done.wait [#allocation2], 32 }
  0x22   :  { %224 = vsyncadd [#allocation2], 4294967264 }
  0x23   :  { %225 = dma.done.wait [#allocation2 + $0x1], 32 }
  0x24   :  { %226 = vsyncadd [#allocation2 + $0x1], 4294967264 }
  0x25   :  { %227 = dma.done.wait [#allocation2 + $0x2], 32 }
  0x26   :  { %228 = vsyncadd [#allocation2 + $0x2], 4294967264 }
  0x27   :  { %229 = dma.done.wait [#allocation2 + $0x3], 32 }
  0x28   :  { %230 = vsyncadd [#allocation2 + $0x3], 4294967264 }
  0x29   :  { %231 = dma.done.wait [#allocation2 + $0x4], 32 }
  0x2a   :  { %232 = vsyncadd [#allocation2 + $0x4], 4294967264 }
  0x2b   :  { %233 = dma.done.wait [#allocation2 + $0x5], 32 }
  0x2c   :  { %234 = vsyncadd [#allocation2 + $0x5], 4294967264 }
  0x2d   :  { %235 = dma.done.wait [#allocation2 + $0x6], 32 }
  0x2e   :  { %236 = vsyncadd [#allocation2 + $0x6], 4294967264 }
  0x2f   :  { %237 = dma.done.wait [#allocation2 + $0x7], 32 }
  0x30   :  { %238 = vsyncadd [#allocation2 + $0x7], 4294967264 }
  0x31   :  { %148 = vsyncmov [#allocation2] }
  0x34   :  { %s149_s0 = vpop.sfrf %148 }
  0x35   :  { %p203_p0 = scmp.ne.s32.totalorder %s149_s0, 0 }
  0x37   :  { %153 = shalt.err (%p203_p0)  }
  0x38   :  { %155 = vsyncmov [#allocation2 + $0x1] }
  0x3b   :  { %s156_s1 = vpop.sfrf %155 }
  0x3c   :  { %p204_p1 = scmp.ne.s32.totalorder %s156_s1, 0 }
  0x3e   :  { %160 = shalt.err (%p204_p1)  }
  0x3f   :  { %162 = vsyncmov [#allocation2 + $0x2] }
  0x42   :  { %s163_s6 = vpop.sfrf %162 }
  0x43   :  { %p205_p2 = scmp.ne.s32.totalorder %s163_s6, 0 }
  0x45   :  { %167 = shalt.err (%p205_p2)  }
  0x46   :  { %169 = vsyncmov [#allocation2 + $0x3] }
  0x49   :  { %s170_s7 = vpop.sfrf %169 }
  0x4a   :  { %p206_p3 = scmp.ne.s32.totalorder %s170_s7, 0 }
  0x4c   :  { %174 = shalt.err (%p206_p3)  }
  0x4d   :  { %176 = vsyncmov [#allocation2 + $0x4] }
  0x50   :  { %s177_s9 = vpop.sfrf %176 }
  0x51   :  { %p207_p4 = scmp.ne.s32.totalorder %s177_s9, 0 }
  0x53   :  { %181 = shalt.err (%p207_p4)  }
  0x54   :  { %183 = vsyncmov [#allocation2 + $0x5] }
  0x57   :  { %s184_s10 = vpop.sfrf %183 }
  0x58   :  { %p208_p5 = scmp.ne.s32.totalorder %s184_s10, 0 }
  0x5a   :  { %188 = shalt.err (%p208_p5)  }
  0x5b   :  { %190 = vsyncmov [#allocation2 + $0x6] }
  0x5e   :  { %s191_s14 = vpop.sfrf %190 }
  0x5f   :  { %p209_p6 = scmp.ne.s32.totalorder %s191_s14, 0 }
  0x61   :  { %195 = shalt.err (%p209_p6)  }
  0x62   :  { %197 = vsyncmov [#allocation2 + $0x7] }
  0x65   :  { %s198_s15 = vpop.sfrf %197 }
  0x66   :  { %p210_p7 = scmp.ne.s32.totalorder %s198_s15, 0 }
  0x68   :  { %202 = shalt.err (%p210_p7)  }

</bundles_post_ra>
